<compile_context>
chip_gen: v7x
topology: tpu7x:2x2x1
jax: 0.10.0
libtpu: 0.0.40
codegen_flags: <defaults>
</compile_context>

<pallas_src>
import functools

import jax
import jax.numpy as jnp
from jax import lax
from jax.experimental import pallas as pl
from jax.experimental.pallas import tpu as pltpu


def stgcn_kernel(x_ref, w1_ref, b1_ref, w2_ref, b2_ref, w3_ref, b3_ref,
                 wfc_ref, bfc_ref, out_ref, *,
                 samples_per_tile, rows_per_sample):
    c_in = x_ref.shape[1]
    spt = samples_per_tile
    rps = rows_per_sample

    # ---- layer 1: A-scale already folded into w1; K = C_in is tiny, so use
    #      VPU broadcast-FMAs instead of a ~3%-utilized MXU pass. ----
    x = x_ref[...]                                            # (TILE_M, C_in)
    h = x[:, 0:1] * w1_ref[0:1, :] + b1_ref[...]              # (TILE_M, 64)
    for c in range(1, c_in):                                  # static unroll
        h = h + x[:, c:c + 1] * w1_ref[c:c + 1, :]
    h = jnp.maximum(h, 0.0)

    # ---- layers 2 & 3: MXU matmuls, bias + ReLU as VPU filler ----
    h = jnp.maximum(jnp.dot(h, w2_ref[...], preferred_element_type=jnp.float32)
                    + b2_ref[...], 0.0)                       # (TILE_M, 128)
    h = jnp.maximum(jnp.dot(h, w3_ref[...], preferred_element_type=jnp.float32)
                    + b3_ref[...], 0.0)                       # (TILE_M, 256)

    # ---- per-sample sum over T (1/T already folded into wfc) ----
    if spt == 1:
        pooled = jnp.sum(h, axis=0, keepdims=True)            # (1, 256)
    elif rps % 8 == 0:
        # tile-aligned sublane split: reshape is a layout no-op, sum is XLU
        pooled = jnp.sum(h.reshape(spt, rps, h.shape[1]), axis=1)   # (spt, 256)
    else:
        # fallback for non-8-aligned T: static per-sample slice sums
        pooled = jnp.concatenate(
            [jnp.sum(h[s * rps:(s + 1) * rps, :], axis=0, keepdims=True)
             for s in range(spt)], axis=0)                    # (spt, 256)

    # ---- single fc matmul per tile + one lane-dense store ----
    logits = jnp.dot(pooled, wfc_ref[...],
                     preferred_element_type=jnp.float32) + bfc_ref[...]

    base = pl.program_id(0) * spt
    if spt % 8 == 0:
        base = pl.multiple_of(base, 8)
    out_ref[pl.ds(base, spt), :] = logits                     # (spt, C_PAD)


def _choose_samples_per_tile(n, rows_per_sample, max_rows_per_tile):
    """Largest samples-per-tile dividing N whose tile is 8-sublane aligned and
    fits the row budget; otherwise the smallest legal (aligned) divisor."""
    aligned = [c for c in range(1, n + 1)
               if n % c == 0 and ((c * rows_per_sample) % 8 == 0 or c == n)]
    within = [c for c in aligned if c * rows_per_sample <= max_rows_per_tile]
    return max(within) if within else min(aligned)


def stgcn_temporal_forward(x_nctv, A_st, w1, b1, w2, b2, w3, b3, fc_w, fc_b,
                           *, max_rows_per_tile=1024):
    """x_nctv: (N, C, T, V) float32.  Conv/linear weights given PyTorch-style."""
    N, C, T, V = x_nctv.shape
    assert V == 1, "nn.Linear(256, num_classes) after flatten requires V == 1"
    num_classes = fc_w.shape[0]
    c_pad = ((num_classes + 127) // 128) * 128          # lane-dense output width
    rows_per_sample = T * V
    M = N * rows_per_sample

    spt = _choose_samples_per_tile(N, rows_per_sample, max_rows_per_tile)
    tile_m = spt * rows_per_sample
    grid = (N // spt,)

    # glue: layout change + weight repacking + A_st / (1/T) folds (no heavy compute)
    x_rows = jnp.transpose(x_nctv, (0, 2, 3, 1)).reshape(M, C).astype(jnp.float32)
    a = A_st[0, 0].astype(jnp.float32)
    w1k = a * jnp.transpose(w1[:, :, 0, 0], (1, 0))      # (C, 64),    A folded in
    w2k = a * jnp.transpose(w2[:, :, 0, 0], (1, 0))      # (64, 128),  A folded in
    w3k = a * jnp.transpose(w3[:, :, 0, 0], (1, 0))      # (128, 256), A folded in
    b1k = b1.reshape(1, -1).astype(jnp.float32)
    b2k = b2.reshape(1, -1).astype(jnp.float32)
    b3k = b3.reshape(1, -1).astype(jnp.float32)
    wfck = jnp.zeros((256, c_pad), jnp.float32).at[:, :num_classes].set(
        jnp.transpose(fc_w, (1, 0)) * (1.0 / T))         # mean's 1/T folded in
    bfck = jnp.zeros((1, c_pad), jnp.float32).at[:, :num_classes].set(
        fc_b.reshape(1, -1))

    def resident(arr):   # full-array block, same block every step -> VMEM-resident
        return pl.BlockSpec(arr.shape, lambda i: (0, 0))

    in_specs = [pl.BlockSpec((tile_m, C), lambda i: (i, 0)),
                resident(w1k), resident(b1k),
                resident(w2k), resident(b2k),
                resident(w3k), resident(b3k),
                resident(wfck), resident(bfck)]
    # Resident output block (revisited each step), written back to HBM once.
    out_spec = pl.BlockSpec((N, c_pad), lambda i: (0, 0))

    flops = 2 * M * (C * 64 + 64 * 128 + 128 * 256) + 2 * N * 256 * c_pad
    bytes_accessed = 4 * (M * C + N * c_pad
                          + C * 64 + 64 * 128 + 128 * 256 + 256 * c_pad
                          + 64 + 128 + 256 + c_pad)

    out = pl.pallas_call(
        functools.partial(stgcn_kernel,
                          samples_per_tile=spt,
                          rows_per_sample=rows_per_sample),
        out_shape=jax.ShapeDtypeStruct((N, c_pad), jnp.float32),
        grid=grid,
        in_specs=in_specs,
        out_specs=out_spec,
        compiler_params=pltpu.CompilerParams(
            dimension_semantics=("arbitrary",),        # output block revisited
            vmem_limit_bytes=32 * 1024 * 1024),
        cost_estimate=pl.CostEstimate(flops=flops, transcendentals=0,
                                      bytes_accessed=bytes_accessed),
    )(x_rows, w1k, b1k, w2k, b2k, w3k, b3k, wfck, bfck)

    return out[:, :num_classes]


def reference_forward(x, A_st, w1, b1, w2, b2, w3, b3, fc_w, fc_b):
    """Pure-JAX mirror of the PyTorch forward (NCTV)."""
    hi = lax.Precision.HIGHEST

    def tgc(x, w, b):
        x = jnp.einsum('nctv,vw->nctw', x, A_st, precision=hi)
        x = jnp.einsum('nctv,oc->notv', x, w[:, :, 0, 0], precision=hi)
        return x + b[None, :, None, None]

    x = jax.nn.relu(tgc(x, w1, b1))
    x = jax.nn.relu(tgc(x, w2, b2))
    x = jax.nn.relu(tgc(x, w3, b3))
    x = x.mean(axis=2)                       # (N, 256, V)
    x = x.reshape(x.shape[0], -1)            # (N, 256*V)
    return jnp.dot(x, fc_w.T, precision=hi) + fc_b


if __name__ == "__main__":
    # Small, deterministic problem: N=2, C_in=4, T=8, V=1, num_classes=10.
    N, C_IN, T, V = 2, 4, 8, 1
    NUM_CLASSES = 10

    key = jax.random.PRNGKey(0)
    keys = jax.random.split(key, 10)

    x = jax.random.normal(keys[0], (N, C_IN, T, V), dtype=jnp.float32)
    A_st = jax.random.normal(keys[1], (V, V), dtype=jnp.float32)

    # Parameter shapes exactly as in the module's __init__ (deterministic init).
    w1 = 0.1 * jax.random.normal(keys[2], (64, C_IN, 1, 1), dtype=jnp.float32)
    b1 = 0.1 * jax.random.normal(keys[3], (64,), dtype=jnp.float32)
    w2 = 0.1 * jax.random.normal(keys[4], (128, 64, 1, 1), dtype=jnp.float32)
    b2 = 0.1 * jax.random.normal(keys[5], (128,), dtype=jnp.float32)
    w3 = 0.1 * jax.random.normal(keys[6], (256, 128, 1, 1), dtype=jnp.float32)
    b3 = 0.1 * jax.random.normal(keys[7], (256,), dtype=jnp.float32)
    fc_w = 0.1 * jax.random.normal(keys[8], (NUM_CLASSES, 256), dtype=jnp.float32)
    fc_b = 0.1 * jax.random.normal(keys[9], (NUM_CLASSES,), dtype=jnp.float32)

    ref = reference_forward(x, A_st, w1, b1, w2, b2, w3, b3, fc_w, fc_b)

    # (a) max_rows_per_tile=8 forces a 2-step grid so the multi-tile path
    #     (resident weights, resident output, per-tile pooling + fc) is exercised.
    out_tiled = stgcn_temporal_forward(x, A_st, w1, b1, w2, b2, w3, b3,
                                       fc_w, fc_b, max_rows_per_tile=8)
    out_tiled = jax.block_until_ready(out_tiled)
    assert out_tiled.shape == (N, NUM_CLASSES)
    assert jnp.allclose(out_tiled, ref, atol=1e-2, rtol=1e-2), (out_tiled, ref)

    # (b) default budget: single-step grid, multi-sample tile + reshape pooling.
    out_full = stgcn_temporal_forward(x, A_st, w1, b1, w2, b2, w3, b3,
                                      fc_w, fc_b)
    out_full = jax.block_until_ready(out_full)
    assert out_full.shape == (N, NUM_CLASSES)
    assert jnp.allclose(out_full, ref, atol=1e-2, rtol=1e-2), (out_full, ref)

    print("KERNEL_OK")
</pallas_src>

<mosaic_0001>
module attributes {stable_mosaic.version = 11 : i64} {
  func.func @stgcn_kernel(%arg0: i32, %arg1: memref<8x4xf32, #tpu.memory_space<vmem>>, %arg2: memref<4x64xf32, #tpu.memory_space<vmem>>, %arg3: memref<1x64xf32, #tpu.memory_space<vmem>>, %arg4: memref<64x128xf32, #tpu.memory_space<vmem>>, %arg5: memref<1x128xf32, #tpu.memory_space<vmem>>, %arg6: memref<128x256xf32, #tpu.memory_space<vmem>>, %arg7: memref<1x256xf32, #tpu.memory_space<vmem>>, %arg8: memref<256x128xf32, #tpu.memory_space<vmem>>, %arg9: memref<1x128xf32, #tpu.memory_space<vmem>>, %arg10: memref<2x128xf32, #tpu.memory_space<vmem>>) attributes {dimension_semantics = [#tpu.dimension_semantics<arbitrary>], iteration_bounds = array<i64: 2>, scalar_prefetch = 0 : i64, scratch_operands = 0 : i64, tpu.core_type = #tpu.core_type<tc>, window_params = [{transform_indices = @transform_0, window_bounds = array<i64: 8, 4>}, {pipeline_mode = #tpu.pipeline_mode<synchronous>, transform_indices = @transform_1, window_bounds = array<i64: 4, 64>}, {pipeline_mode = #tpu.pipeline_mode<synchronous>, transform_indices = @transform_2, window_bounds = array<i64: 1, 64>}, {pipeline_mode = #tpu.pipeline_mode<synchronous>, transform_indices = @transform_3, window_bounds = array<i64: 64, 128>}, {pipeline_mode = #tpu.pipeline_mode<synchronous>, transform_indices = @transform_4, window_bounds = array<i64: 1, 128>}, {pipeline_mode = #tpu.pipeline_mode<synchronous>, transform_indices = @transform_5, window_bounds = array<i64: 128, 256>}, {pipeline_mode = #tpu.pipeline_mode<synchronous>, transform_indices = @transform_6, window_bounds = array<i64: 1, 256>}, {pipeline_mode = #tpu.pipeline_mode<synchronous>, transform_indices = @transform_7, window_bounds = array<i64: 256, 128>}, {pipeline_mode = #tpu.pipeline_mode<synchronous>, transform_indices = @transform_8, window_bounds = array<i64: 1, 128>}, {pipeline_mode = #tpu.pipeline_mode<synchronous>, transform_indices = @transform_9, window_bounds = array<i64: 2, 128>}]} {
    %c0 = arith.constant 0 : index
    %c0_0 = arith.constant 0 : index
    %0 = vector.load %arg1[%c0, %c0_0] : memref<8x4xf32, #tpu.memory_space<vmem>>, vector<8x4xf32>
    %1 = vector.extract_strided_slice %0 {offsets = [0, 0], sizes = [8, 1], strides = [1, 1]} : vector<8x4xf32> to vector<8x1xf32>
    %c0_1 = arith.constant 0 : index
    %c0_2 = arith.constant 0 : index
    %2 = vector.load %arg2[%c0_1, %c0_2] : memref<4x64xf32, #tpu.memory_space<vmem>>, vector<1x64xf32>
    %3 = vector.broadcast %1 : vector<8x1xf32> to vector<8x64xf32>
    %4 = vector.broadcast %2 : vector<1x64xf32> to vector<8x64xf32>
    %5 = arith.mulf %3, %4 : vector<8x64xf32>
    %c0_3 = arith.constant 0 : index
    %c0_4 = arith.constant 0 : index
    %6 = vector.load %arg3[%c0_3, %c0_4] : memref<1x64xf32, #tpu.memory_space<vmem>>, vector<1x64xf32>
    %7 = vector.broadcast %6 : vector<1x64xf32> to vector<8x64xf32>
    %8 = arith.addf %5, %7 : vector<8x64xf32>
    %9 = vector.extract_strided_slice %0 {offsets = [0, 1], sizes = [8, 1], strides = [1, 1]} : vector<8x4xf32> to vector<8x1xf32>
    %c1 = arith.constant 1 : index
    %c0_5 = arith.constant 0 : index
    %10 = vector.load %arg2[%c1, %c0_5] : memref<4x64xf32, #tpu.memory_space<vmem>>, vector<1x64xf32>
    %11 = vector.broadcast %9 : vector<8x1xf32> to vector<8x64xf32>
    %12 = vector.broadcast %10 : vector<1x64xf32> to vector<8x64xf32>
    %13 = arith.mulf %11, %12 : vector<8x64xf32>
    %14 = arith.addf %8, %13 : vector<8x64xf32>
    %15 = vector.extract_strided_slice %0 {offsets = [0, 2], sizes = [8, 1], strides = [1, 1]} : vector<8x4xf32> to vector<8x1xf32>
    %c2 = arith.constant 2 : index
    %c0_6 = arith.constant 0 : index
    %16 = vector.load %arg2[%c2, %c0_6] : memref<4x64xf32, #tpu.memory_space<vmem>>, vector<1x64xf32>
    %17 = vector.broadcast %15 : vector<8x1xf32> to vector<8x64xf32>
    %18 = vector.broadcast %16 : vector<1x64xf32> to vector<8x64xf32>
    %19 = arith.mulf %17, %18 : vector<8x64xf32>
    %20 = arith.addf %14, %19 : vector<8x64xf32>
    %21 = vector.extract_strided_slice %0 {offsets = [0, 3], sizes = [8, 1], strides = [1, 1]} : vector<8x4xf32> to vector<8x1xf32>
    %c3 = arith.constant 3 : index
    %c0_7 = arith.constant 0 : index
    %22 = vector.load %arg2[%c3, %c0_7] : memref<4x64xf32, #tpu.memory_space<vmem>>, vector<1x64xf32>
    %23 = vector.broadcast %21 : vector<8x1xf32> to vector<8x64xf32>
    %24 = vector.broadcast %22 : vector<1x64xf32> to vector<8x64xf32>
    %25 = arith.mulf %23, %24 : vector<8x64xf32>
    %26 = arith.addf %20, %25 : vector<8x64xf32>
    %cst = arith.constant 0.000000e+00 : f32
    %27 = vector.broadcast %cst : f32 to vector<8x64xf32>
    %28 = arith.maximumf %26, %27 : vector<8x64xf32>
    %c0_8 = arith.constant 0 : index
    %c0_9 = arith.constant 0 : index
    %29 = vector.load %arg4[%c0_8, %c0_9] : memref<64x128xf32, #tpu.memory_space<vmem>>, vector<64x128xf32>
    %cst_10 = arith.constant dense<0.000000e+00> : vector<8x128xf32>
    %30 = tpu.matmul %28, %29, %cst_10 {dimension_numbers = #tpu.dot_dimension_numbers<[1], [0], [0], [1], [0, 0, 1, 1], [], []>} : vector<8x64xf32>, vector<64x128xf32>, vector<8x128xf32> -> vector<8x128xf32>
    %c0_11 = arith.constant 0 : index
    %c0_12 = arith.constant 0 : index
    %31 = vector.load %arg5[%c0_11, %c0_12] : memref<1x128xf32, #tpu.memory_space<vmem>>, vector<1x128xf32>
    %32 = vector.broadcast %31 : vector<1x128xf32> to vector<8x128xf32>
    %33 = arith.addf %30, %32 : vector<8x128xf32>
    %cst_13 = arith.constant 0.000000e+00 : f32
    %34 = vector.broadcast %cst_13 : f32 to vector<8x128xf32>
    %35 = arith.maximumf %33, %34 : vector<8x128xf32>
    %c0_14 = arith.constant 0 : index
    %c0_15 = arith.constant 0 : index
    %36 = vector.load %arg6[%c0_14, %c0_15] : memref<128x256xf32, #tpu.memory_space<vmem>>, vector<128x256xf32>
    %cst_16 = arith.constant dense<0.000000e+00> : vector<8x256xf32>
    %37 = tpu.matmul %35, %36, %cst_16 {dimension_numbers = #tpu.dot_dimension_numbers<[1], [0], [0], [1], [0, 0, 1, 1], [], []>} : vector<8x128xf32>, vector<128x256xf32>, vector<8x256xf32> -> vector<8x256xf32>
    %c0_17 = arith.constant 0 : index
    %c0_18 = arith.constant 0 : index
    %38 = vector.load %arg7[%c0_17, %c0_18] : memref<1x256xf32, #tpu.memory_space<vmem>>, vector<1x256xf32>
    %39 = vector.broadcast %38 : vector<1x256xf32> to vector<8x256xf32>
    %40 = arith.addf %37, %39 : vector<8x256xf32>
    %cst_19 = arith.constant 0.000000e+00 : f32
    %41 = vector.broadcast %cst_19 : f32 to vector<8x256xf32>
    %42 = arith.maximumf %40, %41 : vector<8x256xf32>
    %cst_20 = arith.constant dense<0.000000e+00> : vector<256xf32>
    %43 = vector.multi_reduction <add>, %42, %cst_20 [0] : vector<8x256xf32> to vector<256xf32>
    %44 = vector.shape_cast %43 : vector<256xf32> to vector<1x256xf32>
    %c0_21 = arith.constant 0 : index
    %c0_22 = arith.constant 0 : index
    %45 = vector.load %arg8[%c0_21, %c0_22] : memref<256x128xf32, #tpu.memory_space<vmem>>, vector<256x128xf32>
    %cst_23 = arith.constant dense<0.000000e+00> : vector<1x128xf32>
    %46 = tpu.matmul %44, %45, %cst_23 {dimension_numbers = #tpu.dot_dimension_numbers<[1], [0], [0], [1], [0, 0, 1, 1], [], []>} : vector<1x256xf32>, vector<256x128xf32>, vector<1x128xf32> -> vector<1x128xf32>
    %c0_24 = arith.constant 0 : index
    %c0_25 = arith.constant 0 : index
    %47 = vector.load %arg9[%c0_24, %c0_25] : memref<1x128xf32, #tpu.memory_space<vmem>>, vector<1x128xf32>
    %48 = arith.addf %46, %47 : vector<1x128xf32>
    %c1_i32 = arith.constant 1 : i32
    %49 = arith.muli %arg0, %c1_i32 : i32
    %50 = arith.index_cast %49 : i32 to index
    %c0_26 = arith.constant 0 : index
    %51 = vector.load %arg10[%50, %c0_26] : memref<2x128xf32, #tpu.memory_space<vmem>>, vector<1x128xf32>
    tpu.vector_store %arg10[%50, %c0_26], %48 {strides = array<i32>} : memref<2x128xf32, #tpu.memory_space<vmem>>, vector<1x128xf32>,
    return
  }
  func.func @transform_0(%arg0: i32) -> (i32, i32) {
    %c0_i32 = arith.constant 0 : i32
    %c0_i32_0 = arith.constant 0 : i32
    return %arg0, %c0_i32 : i32, i32
  }
  func.func @transform_1(%arg0: i32) -> (i32, i32) {
    %c0_i32 = arith.constant 0 : i32
    %c0_i32_0 = arith.constant 0 : i32
    %c0_i32_1 = arith.constant 0 : i32
    return %c0_i32, %c0_i32_0 : i32, i32
  }
  func.func @transform_2(%arg0: i32) -> (i32, i32) {
    %c0_i32 = arith.constant 0 : i32
    %c0_i32_0 = arith.constant 0 : i32
    %c0_i32_1 = arith.constant 0 : i32
    return %c0_i32, %c0_i32_0 : i32, i32
  }
  func.func @transform_3(%arg0: i32) -> (i32, i32) {
    %c0_i32 = arith.constant 0 : i32
    %c0_i32_0 = arith.constant 0 : i32
    %c0_i32_1 = arith.constant 0 : i32
    return %c0_i32, %c0_i32_0 : i32, i32
  }
  func.func @transform_4(%arg0: i32) -> (i32, i32) {
    %c0_i32 = arith.constant 0 : i32
    %c0_i32_0 = arith.constant 0 : i32
    %c0_i32_1 = arith.constant 0 : i32
    return %c0_i32, %c0_i32_0 : i32, i32
  }
  func.func @transform_5(%arg0: i32) -> (i32, i32) {
    %c0_i32 = arith.constant 0 : i32
    %c0_i32_0 = arith.constant 0 : i32
    %c0_i32_1 = arith.constant 0 : i32
    return %c0_i32, %c0_i32_0 : i32, i32
  }
  func.func @transform_6(%arg0: i32) -> (i32, i32) {
    %c0_i32 = arith.constant 0 : i32
    %c0_i32_0 = arith.constant 0 : i32
    %c0_i32_1 = arith.constant 0 : i32
    return %c0_i32, %c0_i32_0 : i32, i32
  }
  func.func @transform_7(%arg0: i32) -> (i32, i32) {
    %c0_i32 = arith.constant 0 : i32
    %c0_i32_0 = arith.constant 0 : i32
    %c0_i32_1 = arith.constant 0 : i32
    return %c0_i32, %c0_i32_0 : i32, i32
  }
  func.func @transform_8(%arg0: i32) -> (i32, i32) {
    %c0_i32 = arith.constant 0 : i32
    %c0_i32_0 = arith.constant 0 : i32
    %c0_i32_1 = arith.constant 0 : i32
    return %c0_i32, %c0_i32_0 : i32, i32
  }
  func.func @transform_9(%arg0: i32) -> (i32, i32) {
    %c0_i32 = arith.constant 0 : i32
    %c0_i32_0 = arith.constant 0 : i32
    %c0_i32_1 = arith.constant 0 : i32
    return %c0_i32, %c0_i32_0 : i32, i32
  }
}

</mosaic_0001>

<bundles_post_ra>
// kernel: tpu_custom_call.1
= control target key start
LH: loop header
LB: loop body
LE: loop exit
PB: predicated region body
PF: predicated region fallthrough
CT: control target
= control target key end

     0   :  { %14 = vsyncpa [#allocation3], 0  ;;  %s1404_s0 = inlined_call_operand.vmem [shape: f32[16,4], index: 0, kind: input, shape index: {}]   ;;  %s1405_s1 = inlined_call_operand.vmem [shape: f32[4,64], index: 1, kind: input, shape index: {}]   ;;  %s1406_s2 = inlined_call_operand.vmem [shape: f32[1,64], index: 2, kind: input, shape index: {}]   ;;  %s1407_s3 = inlined_call_operand.hbm [shape: f32[64,128], index: 3, kind: input, shape index: {}]   ;;  %s1408_s4 = inlined_call_operand.vmem [shape: f32[1,128], index: 4, kind: input, shape index: {}]   ;;  %s1409_s5 = inlined_call_operand.hbm [shape: f32[128,256], index: 5, kind: input, shape index: {}]   ;;  %s1410_s6 = inlined_call_operand.vmem [shape: f32[1,256], index: 6, kind: input, shape index: {}]   ;;  %s1411_s7 = inlined_call_operand.hbm [shape: f32[256,128], index: 7, kind: input, shape index: {}]   ;;  %s1412_s8 = inlined_call_operand.vmem [shape: f32[1,128], index: 8, kind: input, shape index: {}]   ;;  %s1413_s9 = inlined_call_operand.hbm [shape: f32[2,128], index: 9, kind: output, shape index: {}]  }
   0x1   :  { %15 = vsyncpa [#allocation6], 0 }
   0x2   :  { %16 = vsyncpa [#allocation4], 0  ;;  %s1238_s30 = smov 0  }
   0x3 LB: > { %s1173_s10 = smov [#allocation5]   ;;  %s1244_s12 = sadd.s32 4294967295, %s1171_s30   ;;  %s1171_s30 = sphi %s1238_s30, %s22_s30  }
   0x4   : > { %s276_s11 = sshll.u32 %s1173_s10, 4  ;;  %p817_p0 = scmp.ge.s32.totalorder %s1171_s30, 1  ;;  %s1253_s11 = int_to_ptr.vmem [resolvable:$true] %s276_s11 }
   0x5   : > { %p242_p1 = scmp.lt.s32.totalorder %s1171_s30, 3  ;;  %p1414_p2 = scmp.eq.s32.totalorder %s1244_s12, 0 }
   0x6   : > { %s1174_s14 = smov [#allocation2]   ;;  %s1175_s17 = smov [#allocation7]  }
   0x7   : > { %p1249_p3 = pnand %p817_p0, %p242_p1  ;;  %s260_s15 = sshll.u32 %s1174_s14, 4  ;;  %s1257_s15 = int_to_ptr.vmem [resolvable:$true] %s260_s15 }
   0x8   : > { %s1265_s18 = sshll.u32 %s1175_s17, 4  ;;  %s1043_s21 = scalar_lea.hbm %s1409_s5, 4096  ;;  %s293_s18 = int_to_ptr.vmem [resolvable:$true] %s1265_s18 }
   0x9   : > { %s1416_s13 = scalar_select %p1249_p3, 1, 0 }
   0xa   : > { %p997_p4 = pneg %p1249_p3  ;;  %p1044_p6 = scmp.ne.s32.totalorder %s1409_s5, %s1043_s21 }
   0xb   : > { %p1050_p10 = scmp.lt.u32.totalorder %s1043_s21, %s1409_s5 }
   0xc   : > { %p1261_p5 = pnand %p1414_p2, %p997_p4 }
   0xe   : > { %p1275_p7 = pneg %p1261_p5 }
  0x10   : > { %p1046_p8 = pnand %p1275_p7, %p1044_p6 }
  0x12   : > { %p1047_p9 = pneg %p1046_p8 }
  0x14   : > { %p1052_p11 = pnand %p1050_p10, %p1047_p9 }
  0x16   : > { %1055 = shalt.err (!%p1052_p11)
}
  0x17   : > { %s1056_s27 = scalar_lea.vmem %s1253_s11, 4096  ;;  %p1064_p1 = scmp.lt.s32.totalorder %s1253_s11, %s1253_s11 }
  0x18   : > { %p1057_p12 = scmp.ne.s32.totalorder %s1253_s11, %s1056_s27  ;;  %p1065_p4 = scmp.lt.s32.totalorder %s1056_s27, %s1056_s27 }
  0x1a   : > { %p1059_p13 = pnand %p1057_p12, %p1275_p7  ;;  %p1066_p6 = por %p1065_p4, %p1064_p1 }
  0x1c   : > { %p1060_p0 = pneg %p1059_p13 }
  0x1e   : > { %p1067_p8 = pnand %p1066_p6, %p1060_p0 }
  0x20   : > { %1070 = shalt.err (!%p1067_p8)
}
  0x21   : > { %s1176_s28 = smov 256   ;;  %s1177_s29 = smov 16  }
  0x22   : > { %1003 = dma.hbm_to_vmem [thread:$0]  (!%p1261_p5), %s1409_s5, 4096, %s1253_s11, [#allocation6], %s1176_s28, %s1176_s28, %s1177_s29  }
  0x23   : > { %s1071_s20 = scalar_lea.hbm %s1407_s3, 1024 }
  0x24   : > { %p1072_p9 = scmp.ne.s32.totalorder %s1407_s3, %s1071_s20  ;;  %p1078_p12 = scmp.lt.u32.totalorder %s1071_s20, %s1407_s3 }
  0x26   : > { %p1074_p10 = pnand %p1072_p9, %p1275_p7 }
  0x28   : > { %p1075_p11 = pneg %p1074_p10 }
  0x2a   : > { %p1080_p13 = pnand %p1078_p12, %p1075_p11 }
  0x2c   : > { %1083 = shalt.err (!%p1080_p13)
}
  0x2d   : > { %s1084_s11 = scalar_lea.vmem %s1257_s15, 1024  ;;  %p1092_p6 = scmp.lt.s32.totalorder %s1257_s15, %s1257_s15 }
  0x2e   : > { %p1085_p0 = scmp.ne.s32.totalorder %s1257_s15, %s1084_s11  ;;  %p1093_p8 = scmp.lt.s32.totalorder %s1084_s11, %s1084_s11 }
  0x30   : > { %p1087_p1 = pnand %p1085_p0, %p1275_p7  ;;  %p1094_p9 = por %p1093_p8, %p1092_p6 }
  0x32   : > { %p1088_p4 = pneg %p1087_p1 }
  0x34   : > { %p1095_p10 = pnand %p1094_p9, %p1088_p4 }
  0x36   : > { %1098 = shalt.err (!%p1095_p10)
}
  0x37   : > { %s1178_s26 = smov 128   ;;  %s1179_s27 = smov 8  }
  0x38   : > { %1000 = dma.hbm_to_vmem [thread:$0]  (!%p1261_p5), %s1407_s3, 1024, %s1257_s15, [#allocation3], %s1178_s26, %s1178_s26, %s1179_s27  }
  0x39   : > { %s1099_s17 = scalar_lea.hbm %s1411_s7, 4096 }
  0x3a   : > { %p1100_p11 = scmp.ne.s32.totalorder %s1411_s7, %s1099_s17  ;;  %p1106_p0 = scmp.lt.u32.totalorder %s1099_s17, %s1411_s7 }
  0x3c   : > { %p1102_p12 = pnand %p1100_p11, %p1275_p7 }
  0x3e   : > { %p1103_p13 = pneg %p1102_p12 }
  0x40   : > { %p1108_p1 = pnand %p1106_p0, %p1103_p13 }
  0x42   : > { %1111 = shalt.err (!%p1108_p1)
}
  0x43   : > { %s1112_s23 = scalar_lea.vmem %s293_s18, 4096  ;;  %p1120_p9 = scmp.lt.s32.totalorder %s293_s18, %s293_s18 }
  0x44   : > { %p1113_p4 = scmp.ne.s32.totalorder %s293_s18, %s1112_s23  ;;  %p1121_p10 = scmp.lt.s32.totalorder %s1112_s23, %s1112_s23 }
  0x46   : > { %p1115_p6 = pnand %p1113_p4, %p1275_p7  ;;  %p1122_p2 = por %p1121_p10, %p1120_p9 }
  0x48   : > { %p1116_p8 = pneg %p1115_p6 }
  0x4a   : > { %p1123_p3 = pnand %p1122_p2, %p1116_p8 }
  0x4c   : > { %1126 = shalt.err (!%p1123_p3)
}
  0x4d   : > { %1006 = dma.hbm_to_vmem [thread:$0]  (!%p1261_p5), %s1411_s7, 4096, %s293_s18, [#allocation6], %s1178_s26, %s1178_s26, %s1179_s27  }
  0x4e   : > { %p1419_p11 = scmp.ne.s32.totalorder %s1416_s13, 0 }
  0x4f   : > { %p1420_p12 = scmp.eq.s32.totalorder (!%p1419_p11), %s1244_s12, 0 }
  0x50   : > { %318 = sbr.rel (%p1419_p11) target bundleno = 920 (0x398), region = 56 }
  0x57   : > { %1158 = dma.done.wait (%p1420_p12), [#allocation3], 1024   ;;  %p1421_p7 = pmov %p1420_p12 }
  0x59   : > { %1160 = vsyncadd (%p1421_p7), [#allocation3], 4294966272  ;;  %p1422_p13 = pmov %p1421_p7 }
  0x5a   : > { %p1423_p2 = pmov %p1421_p7 }
  0x5b   : > { %1162 = dma.done.wait (%p1422_p13), [#allocation6], 8192  }
  0x5c   : > { %1164 = vsyncadd (%p1423_p2), [#allocation6], 4294959104  ;;  %p356_p3 = scmp.lt.s32.totalorder %s1244_s12, 1  ;;  %v1180_v0 = vmov 0   ;;  %v1181_v1 = vmov 2   ;;  %v1182_v2 = vmov 0.0|0.0  }
  0x5d   : > { %1038 = vset.pattern.permute.xlu0 %v1180_v0  ;;  %1040 = vset.pattern.permute.xlu1 %v1181_v1  ;;  %v414_v4 = vld [vmem:[#allocation2] sm:$0xff]  ;;  %v415_v5 = vld [vmem:[#allocation2 + $0x8] sm:$0xff]  ;;  %v416_v7 = vld [vmem:[#allocation2 + $0x10] sm:$0xff]  ;;  %v1183_v10 = vmov 1   ;;  %v1184_v11 = vmov 3   ;;  %vm1185_vm0 = vmmov 0  }
  0x5e   : > { %s357_s13 = scalar_select %p356_p3, %s1244_s12, 1  ;;  %905 = vmatprep.subr.bf16.mxu0 %v1182_v2  ;;  %v906_v6 = vpack.c.bf16 %v415_v5, %v414_v4  ;;  %v417_v8 = vld [vmem:[#allocation2 + $0x18] sm:$0xff]  ;;  %v418_v12 = vld [vmem:[#allocation2 + $0x20] sm:$0xff]  ;;  %v419_v13 = vld [vmem:[#allocation2 + $0x28] sm:$0xff]  ;;  %v1186_v18 = vmov 0.0   ;;  %vm429_vm1 = vcmask 523264  }
  0x5f   : > { %v909_v9 = vpack.c.bf16 %v417_v8, %v416_v7  ;;  %v912_v14 = vpack.c.bf16 %v419_v13, %v418_v12  ;;  %v420_v15 = vld [vmem:[#allocation2 + $0x30] sm:$0xff]  ;;  %v421_v16 = vld [vmem:[#allocation2 + $0x38] sm:$0xff]  ;;  %902 = vmatprep.mubr.msk.f32.mxu0 %vm1185_vm0, %v1186_v18  ;;  %612 = vmatprep.mubr.f32.mxu1 %v1186_v18  ;;  %v505_v19 = vld [vmem:[#allocation5 + $0x8] sm:$0xff]  ;;  %s1187_s18 = smov [#allocation8]   ;;  %p1013_p5 = scmp.eq.s32.totalorder %s1244_s12, 1 }
  0x60   : > { %s826_s16 = sshll.u32 %s357_s13, 3  ;;  %907 = vmatpush3.bf16.msra.mxu0 %v906_v6  ;;  %v915_v17 = vpack.c.bf16 %v421_v16, %v420_v15  ;;  %v507_v20 = vld [vmem:[#allocation5 + $0x18] sm:$0xff]  ;;  %v504_v21 = vld [vmem:[#allocation5] sm:$0xff]  ;;  %v506_v23 = vld [vmem:[#allocation5 + $0x10] sm:$0xff]  ;;  %s745_s24 = sshll.u32 %s1187_s18, 4  ;;  %s746_s24 = int_to_ptr.vmem [resolvable:$true] %s745_s24 }
  0x61   : > { %s359_s11 = scalar_lea.vmem %s1404_s0, %s826_s16  ;;  %908 = vmatprep.subr.bf16.mxu0 %v1182_v2  ;;  %v917_v22 = vpack.c.bf16 %v507_v20, %v505_v19  ;;  %v509_v24 = vld [vmem:[#allocation5 + $0x28] sm:$0xff]  ;;  %v511_v25 = vld [vmem:[#allocation5 + $0x38] sm:$0xff]  ;;  %v919_v26 = vpack.c.bf16 %v506_v23, %v504_v21  ;;  %v508_v28 = vld [vmem:[#allocation5 + $0x20] sm:$0xff]  ;;  %s1127_s26 = scalar_lea.vmem %s746_s24, 32 }
  0x62   : > { %v360_v3 = vld [vmem:[%s359_s11] sm:$0xff]  ;;  %v921_v27 = vpack.c.bf16 %v511_v25, %v509_v24  ;;  %v510_v29 = vld [vmem:[#allocation5 + $0x30] sm:$0xff]  ;;  %v515_v31 = vld [vmem:[#allocation5 + $0x58] sm:$0xff]  ;;  %s839_s11 = scalar_lea.vmem [#allocation8], %s1171_s30  ;;  %p1128_p0 = scmp.ne.s32.totalorder %s746_s24, %s1127_s26 }
  0x63   : > { %364 = vperm.xlu0 %1038, %v360_v3   ;;  %393 = vperm.xlu1 %1040, %v360_v3   ;;  %v513_v30 = vld [vmem:[#allocation5 + $0x48] sm:$0xff]  ;;  %v923_v32 = vpack.c.bf16 %v510_v29, %v508_v28  ;;  %v512_v34 = vld [vmem:[#allocation5 + $0x40] sm:$0xff]  ;;  %v514_v35 = vld [vmem:[#allocation5 + $0x50] sm:$0xff]  ;;  %p1134_p6 = scmp.lt.s32.totalorder %s746_s24, %s746_s24  ;;  %p1135_p8 = scmp.lt.s32.totalorder %s1127_s26, %s1127_s26 }
  0x64   : > { %910 = vmatpush3.bf16.msra.mxu0 %v909_v9  ;;  %918 = vmatprep.subr.bf16.mxu1 %v917_v22  ;;  %v925_v33 = vpack.c.bf16 %v515_v31, %v513_v30  ;;  %v517_v36 = vld [vmem:[#allocation5 + $0x68] sm:$0xff]  ;;  %v519_v37 = vld [vmem:[#allocation5 + $0x78] sm:$0xff]  ;;  %v927_v38 = vpack.c.bf16 %v514_v35, %v512_v34  ;;  %v516_v40 = vld [vmem:[#allocation5 + $0x60] sm:$0xff]  ;;  %p1129_p1 = pnand %p1128_p0, %p1013_p5 }
  0x65   : > { %911 = vmatprep.subr.bf16.mxu0 %v1182_v2  ;;  %920 = vmatpush1.bf16.msra.mxu1 %v919_v26  ;;  %v929_v39 = vpack.c.bf16 %v519_v37, %v517_v36  ;;  %v518_v41 = vld [vmem:[#allocation5 + $0x70] sm:$0xff]  ;;  %v521_v42 = vld [vmem:[#allocation5 + $0x88] sm:$0xff]  ;;  %v523_v43 = vld [vmem:[#allocation5 + $0x98] sm:$0xff]  ;;  %p1136_p9 = por %p1135_p8, %p1134_p6 }
  0x66   : > { %922 = vmatprep.subr.bf16.mxu1 %v921_v27  ;;  %v931_v44 = vpack.c.bf16 %v518_v41, %v516_v40  ;;  %v933_v45 = vpack.c.bf16 %v523_v43, %v521_v42  ;;  %v520_v46 = vld [vmem:[#allocation5 + $0x80] sm:$0xff]  ;;  %v522_v47 = vld [vmem:[#allocation5 + $0x90] sm:$0xff]  ;;  %v525_v48 = vld [vmem:[#allocation5 + $0xa8] sm:$0xff]  ;;  %p1130_p4 = pneg %p1129_p1 }
  0x67   : > { %1039 = vset.pattern.permute.xlu0 %v1183_v10  ;;  %1041 = vset.pattern.permute.xlu1 %v1184_v11  ;;  %v527_v49 = vld [vmem:[#allocation5 + $0xb8] sm:$0xff]  ;;  %v935_v50 = vpack.c.bf16 %v522_v47, %v520_v46  ;;  %v524_v52 = vld [vmem:[#allocation5 + $0xa0] sm:$0xff]  ;;  %v526_v53 = vld [vmem:[#allocation5 + $0xb0] sm:$0xff] }
  0x68   : > { %382 = vperm.xlu0 %1039, %v360_v3   ;;  %404 = vperm.xlu1 %1041, %v360_v3   ;;  %v937_v51 = vpack.c.bf16 %v527_v49, %v525_v48  ;;  %v529_v54 = vld [vmem:[#allocation5 + $0xc8] sm:$0xff]  ;;  %v531_v55 = vld [vmem:[#allocation5 + $0xd8] sm:$0xff]  ;;  %v939_v56 = vpack.c.bf16 %v526_v53, %v524_v52  ;;  %v528_v58 = vld [vmem:[#allocation5 + $0xc0] sm:$0xff]  ;;  %p1137_p10 = pnand %p1136_p9, %p1130_p4 }
  0x69   : > { %913 = vmatpush3.bf16.msra.mxu0 %v912_v14  ;;  %924 = vmatpush1.bf16.msra.mxu1 %v923_v32  ;;  %v941_v57 = vpack.c.bf16 %v531_v55, %v529_v54  ;;  %v530_v59 = vld [vmem:[#allocation5 + $0xd0] sm:$0xff]  ;;  %v827_v61 = vld [vmem:[%s1405_s1] ss:$0 sm:$0xff]  ;;  %v830_v3 = vld [vmem:[%s1405_s1 + $0x2] ss:$0 sm:$0xff] }
  0x6a   : > { %914 = vmatprep.subr.bf16.mxu0 %v1182_v2  ;;  %926 = vmatprep.subr.bf16.mxu1 %v925_v33  ;;  %v943_v60 = vpack.c.bf16 %v530_v59, %v528_v58  ;;  %v828_v1 = vld [vmem:[%s1406_s2] ss:$0 sm:$0xff]  ;;  %v829_v2 = vld [vmem:[%s1405_s1 + $0x1] ss:$0 sm:$0xff]  ;;  %v831_v5 = vld [vmem:[%s1405_s1 + $0x3] ss:$0 sm:$0xff] }
  0x6b   : > { %v533_v15 = vld [vmem:[#allocation5 + $0xe8] sm:$0xff]  ;;  %v535_v16 = vld [vmem:[#allocation5 + $0xf8] sm:$0xff]  ;;  %v532_v18 = vld [vmem:[#allocation5 + $0xe0] sm:$0xff] }
  0x6c   : > { %1042 = vset.pattern.permute.xlu0 %v1184_v11  ;;  %v534_v19 = vld [vmem:[#allocation5 + $0xf0] sm:$0xff]  ;;  %v649_v21 = vld [vmem:[#allocation7 + $0x80] sm:$0xff]  ;;  %v650_v22 = vld [vmem:[#allocation7 + $0x88] sm:$0xff] }
  0x6d   : > { %916 = vmatpush3.bf16.msra.mxu0 %v915_v17  ;;  %928 = vmatpush1.bf16.msra.mxu1 %v927_v38  ;;  %v945_v17 = vpack.c.bf16 %v535_v16, %v533_v15  ;;  %v947_v20 = vpack.c.bf16 %v534_v19, %v532_v18  ;;  %v633_v23 = vld [vmem:[#allocation7] sm:$0xff]  ;;  %v949_v24 = vpack.c.bf16 %v650_v22, %v649_v21  ;;  %v634_v25 = vld [vmem:[#allocation7 + $0x8] sm:$0xff]  ;;  %v651_v26 = vld [vmem:[#allocation7 + $0x90] sm:$0xff] }
  0x6e   : > { %930 = vmatprep.subr.bf16.mxu1 %v929_v39  ;;  %v652_v27 = vld [vmem:[#allocation7 + $0x98] sm:$0xff]  ;;  %v951_v28 = vpack.c.bf16 %v634_v25, %v633_v23  ;;  %v635_v30 = vld [vmem:[#allocation7 + $0x10] sm:$0xff]  ;;  %v653_v32 = vld [vmem:[#allocation7 + $0xa0] sm:$0xff] }
  0x6f   : > { %v953_v29 = vpack.c.bf16 %v652_v27, %v651_v26  ;;  %v636_v31 = vld [vmem:[#allocation7 + $0x18] sm:$0xff]  ;;  %950 = vmatprep.subr.bf16.mxu0 %v949_v24  ;;  %v654_v33 = vld [vmem:[#allocation7 + $0xa8] sm:$0xff]  ;;  %v637_v36 = vld [vmem:[#allocation7 + $0x20] sm:$0xff] }
  0x70   : > { %v955_v34 = vpack.c.bf16 %v636_v31, %v635_v30  ;;  %v957_v35 = vpack.c.bf16 %v654_v33, %v653_v32  ;;  %v638_v37 = vld [vmem:[#allocation7 + $0x28] sm:$0xff]  ;;  %v655_v38 = vld [vmem:[#allocation7 + $0xb0] sm:$0xff]  ;;  %v656_v39 = vld [vmem:[#allocation7 + $0xb8] sm:$0xff] }
  0x71   : > { %932 = vmatpush1.bf16.msra.mxu1 %v931_v44  ;;  %v959_v40 = vpack.c.bf16 %v638_v37, %v637_v36  ;;  %v961_v41 = vpack.c.bf16 %v656_v39, %v655_v38  ;;  %v832_v42 = vld [vmem:[%s1408_s4] ss:$0 sm:$0xff]  ;;  %v639_v47 = vld [vmem:[#allocation7 + $0x30] sm:$0xff]  ;;  %v640_v48 = vld [vmem:[#allocation7 + $0x38] sm:$0xff] }
  0x72   : > { %934 = vmatprep.subr.bf16.mxu1 %v933_v45  ;;  %v963_v49 = vpack.c.bf16 %v640_v48, %v639_v47  ;;  %v641_v53 = vld [vmem:[#allocation7 + $0x40] sm:$0xff]  ;;  %v642_v54 = vld [vmem:[#allocation7 + $0x48] sm:$0xff]  ;;  %v643_v59 = vld [vmem:[#allocation7 + $0x50] sm:$0xff] }
  0x73   : > { %v967_v55 = vpack.c.bf16 %v642_v54, %v641_v53  ;;  %v665_v36 = vld [vmem:[%s1412_s8] sm:$0x1] }
  0x75   : > { %936 = vmatpush1.bf16.msra.mxu1 %v935_v50  ;;  %v657_v50 = vld [vmem:[#allocation7 + $0xc0] sm:$0xff] }
  0x76   : > { %938 = vmatprep.subr.bf16.mxu1 %v937_v51  ;;  %v658_v51 = vld [vmem:[#allocation7 + $0xc8] sm:$0xff] }
  0x77   : > { %v965_v52 = vpack.c.bf16 %v658_v51, %v657_v50 }
  0x79   : > { %940 = vmatpush1.bf16.msra.mxu1 %v939_v56  ;;  %v659_v56 = vld [vmem:[#allocation7 + $0xd0] sm:$0xff] }
  0x7a   : > { %942 = vmatprep.subr.bf16.mxu1 %v941_v57  ;;  %v660_v57 = vld [vmem:[#allocation7 + $0xd8] sm:$0xff] }
  0x7b   : > { %v969_v58 = vpack.c.bf16 %v660_v57, %v659_v56 }
  0x7d   : > { %944 = vmatpush1.bf16.msra.mxu1 %v943_v60  ;;  %v644_v60 = vld [vmem:[#allocation7 + $0x58] sm:$0xff] }
  0x7e   : > { %946 = vmatprep.subr.bf16.mxu1 %v945_v17 }
  0x81   : > { %948 = vmatpush1.bf16.msra.mxu1 %v947_v20 }
  0xe2   : > { %v365_v62 = vpop.permute.xlu0 %364  ;;  %v394_v63 = vpop.permute.xlu1 %393 }
  0xe3   : > { %v371_v0 = vmul.f32 %v827_v61, %v365_v62  ;;  %v400_v9 = vmul.f32 %v830_v3, %v394_v63  ;;  %v971_v61 = vpack.c.bf16 %v644_v60, %v643_v59  ;;  %v661_v62 = vld [vmem:[#allocation7 + $0xe0] sm:$0xff]  ;;  %v662_v63 = vld [vmem:[#allocation7 + $0xe8] sm:$0xff] }
  0xe5   : > { %v379_v7 = vadd.f32 %v828_v1, %v371_v0  ;;  %v973_v0 = vpack.c.bf16 %v662_v63, %v661_v62  ;;  %v645_v1 = vld [vmem:[#allocation7 + $0x60] sm:$0xff] }
  0xe7   : > { %v383_v4 = vpop.permute.xlu0 %382  ;;  %v405_v6 = vpop.permute.xlu1 %404 }
  0xe8   : > { %v389_v8 = vmul.f32 %v829_v2, %v383_v4  ;;  %v411_v11 = vmul.f32 %v831_v5, %v405_v6  ;;  %v646_v2 = vld [vmem:[#allocation7 + $0x68] sm:$0xff]  ;;  %v663_v4 = vld [vmem:[#allocation7 + $0xf0] sm:$0xff]  ;;  %v664_v5 = vld [vmem:[#allocation7 + $0xf8] sm:$0xff] }
  0xe9   : > { %v975_v3 = vpack.c.bf16 %v646_v2, %v645_v1  ;;  %v977_v6 = vpack.c.bf16 %v664_v5, %v663_v4 }
  0xea   : > { %v390_v10 = vadd.f32 %v389_v8, %v379_v7  ;;  %v647_v7 = vld [vmem:[#allocation7 + $0x70] sm:$0xff]  ;;  %v648_v8 = vld [vmem:[#allocation7 + $0x78] sm:$0xff] }
  0xec   : > { %v401_v12 = vadd.f32 %v400_v9, %v390_v10  ;;  %v979_v9 = vpack.c.bf16 %v648_v8, %v647_v7  ;;  %v538_v10 = vlaneseq }
  0xee   : > { %v412_v13 = vadd.f32 %v411_v11, %v401_v12  ;;  %v539_v11 = vshrl.u32 %v538_v10, 7 }
  0xf0   : > { %v413_v14 = vmax.f32 %v412_v13, 0.0  ;;  %v540_v12 = vsub.s32 0, %v539_v11  ;;  %v536_v13 = vld [vmem:[%s1410_s6] sm:$0x3] }
  0xf2   : > { %903 = vmatmul.mubr.msk.f32.vlgmr.msra.gmra.mrb[0].mxu0 %vm429_vm1, %v413_v14  ;;  %v544_v14 = vsub.s32 1, %v539_v11  ;;  %v541_v15 = vrot.slane %v536_v13, %v540_v12 }
  0xf3   : > { %952 = vmatpush3.bf16.msra.mxu0 %v951_v28 }
  0xf4   : > { %954 = vmatprep.subr.bf16.mxu0 %v953_v29  ;;  %v545_v16 = vrot.slane %v536_v13, %v544_v14 }
  0xf7   : > { %956 = vmatpush3.bf16.msra.mxu0 %v955_v34 }
  0xf8   : > { %958 = vmatprep.subr.bf16.mxu0 %v957_v35 }
  0xfb   : > { %960 = vmatpush3.bf16.msra.mxu0 %v959_v40 }
  0xfc   : > { %962 = vmatprep.subr.bf16.mxu0 %v961_v41 }
  0xff   : > { %964 = vmatpush3.bf16.msra.mxu0 %v963_v49 }
 0x100   : > { %966 = vmatprep.subr.bf16.mxu0 %v965_v52 }
 0x103   : > { %968 = vmatpush3.bf16.msra.mxu0 %v967_v55 }
 0x104   : > { %970 = vmatprep.subr.bf16.mxu0 %v969_v58 }
 0x107   : > { %972 = vmatpush3.bf16.msra.mxu0 %v971_v61 }
 0x108   : > { %974 = vmatprep.subr.bf16.mxu0 %v973_v0 }
 0x10b   : > { %976 = vmatpush3.bf16.msra.mxu0 %v975_v3 }
 0x10c   : > { %978 = vmatprep.subr.bf16.mxu0 %v977_v6 }
 0x10f   : > { %980 = vmatpush3.bf16.msra.mxu0 %v979_v9 }
 0x1c5   : > { %v499_v43 = vpop.f32.mrb[0].mxu0 }
 0x1c6   : > { %v500_v44 = vadd.f32 %v832_v42, %v499_v43  ;;  %v904_v45 = vpop.f32.mrb[1].mxu0 }
 0x1c8   : > { %v503_v46 = vmax.f32 %v500_v44, 0.0 }
 0x1ca   : > { %613 = vmatmul.mubr.f32.vlgmr.msra.gmra.mrb[0].mxu1 %v503_v46 }
 0x29d   : > { %v614_v17 = vpop.f32.mrb[0].mxu1 }
 0x29e   : > { %v615_v18 = vadd.f32 %v614_v17, %v541_v15  ;;  %v616_v19 = vpop.f32.mrb[1].mxu1 }
 0x29f   : > { %v617_v20 = vadd.f32 %v616_v19, %v545_v16 }
 0x2a0   : > { %v619_v21 = vmax.f32 %v615_v18, 0.0 }
 0x2a1   : > { %v620_v22 = vmax.f32 %v617_v20, 0.0 }
 0x2a2   : > { %v621_v23 = vrot.slane %v619_v21, 4 }
 0x2a3   : > { %v627_v24 = vrot.slane %v620_v22, 4 }
 0x2a4   : > { %v622_v25 = vadd.f32 %v621_v23, %v619_v21 }
 0x2a5   : > { %v628_v26 = vadd.f32 %v627_v24, %v620_v22 }
 0x2a6   : > { %v623_v27 = vrot.slane %v622_v25, 2 }
 0x2a7   : > { %v629_v28 = vrot.slane %v628_v26, 2 }
 0x2a8   : > { %v624_v29 = vadd.f32 %v623_v27, %v622_v25 }
 0x2a9   : > { %v630_v30 = vadd.f32 %v629_v28, %v628_v26 }
 0x2aa   : > { %v625_v31 = vrot.slane %v624_v29, 1 }
 0x2ab   : > { %v631_v32 = vrot.slane %v630_v30, 1 }
 0x2ac   : > { %v626_v34 = vadd.f32 %v625_v31, %v624_v29 }
 0x2ad   : > { %v632_v33 = vadd.f32 %v631_v32, %v630_v30 }
 0x2af   : > { %730 = vmatprep.mubr.f32.mxu0 %v632_v33 }
 0x2b0   : > { %731 = vmatmul.mubr.f32.vlgmr.msra.gmra.mrb[2].mxu0 %v626_v34 }
 0x383   : > { %v883_v35 = vpop.f32.mrb[2].mxu0 }
 0x384   : > { %v884_v37 = vpop.f32.mrb[3].mxu0 }
 0x385   : > { %v885_v38 = vadd.f32 %v884_v37, %v883_v35 }
 0x387   : > { %v733_v39 = vadd.f32 %v885_v38, %v665_v36 }
 0x389   : > { %841 = vst [vmem:[%s839_s11 - $0x1] sm:$0x1] %v733_v39 }
 0x38a   : > { %1140 = shalt.err (!%p1137_p10)
}
 0x38b   : > { %s1141_s29 = scalar_lea.hbm %s1413_s9, 32 }
 0x38c   : > { %p1142_p11 = scmp.ne.s32.totalorder %s1413_s9, %s1141_s29  ;;  %p1147_p13 = scmp.lt.u32.totalorder %s1141_s29, %s1413_s9 }
 0x38e   : > { %p1143_p12 = pnand %p1142_p11, %p1013_p5 }
 0x390   : > { %p1144_p7 = pneg %p1143_p12 }
 0x392   : > { %p1149_p2 = pnand %p1147_p13, %p1144_p7 }
 0x394   : > { %1152 = shalt.err (!%p1149_p2)
}
 0x395   : > { %994 = dma.vmem_to_hbm [thread:$0]  (%p1013_p5), %s746_s24, 32, %s1413_s9, [#allocation4]  }
 0x396   : > { %1166 = dma.done.wait (%p1013_p5), [#allocation4], 32  }
 0x397   : > { %1168 = vsyncadd (%p1013_p5), [#allocation4], 4294967264 }
 0x398 PF: > { %s22_s30 = sadd.s32 1, %s1171_s30  }
 0x399   : > { %p19_p3 = scmp.ge.s32.totalorder %s22_s30, 4  }
 0x39b   :  { %21 = sbr.rel (!%p19_p3) target bundleno = 3 (0x3), region = 97 }
 0x3a2   :  { %758 = vsyncpa [#allocation3], 1 }
 0x3a3   :  { %760 = vsyncpa [#allocation3 + $0x1], 1 }
 0x3a4   :  { %761 = vsyncpa [#allocation6], 1 }
 0x3a5   :  { %762 = vsyncpa [#allocation4], 1 }
 0x3a6   :  { %764 = vsyncpa [#allocation4 + $0x1], 1 }

</bundles_post_ra>
